<compile_context>
chip_gen: v7x
topology: tpu7x:2x2x1
jax: 0.10.0
libtpu: 0.0.40
codegen_flags: <defaults>
</compile_context>

<pallas_src>
import functools

import jax
import jax.numpy as jnp
from jax.experimental import pallas as pl
from jax.experimental.pallas import tpu as pltpu


def _round_up(n, m):
    return ((n + m - 1) // m) * m


def _mlp_fused_kernel(*refs, num_layers, softplus_at_end, matmul_dtype):
    """Fused MLP on one (TM, K0p) row tile.

    refs = (x_ref, w0, b0, w1, b1, ..., w_{L-1}, b_{L-1}, o_ref)
    Weights are pre-cast to `matmul_dtype`; biases are f32 of shape (1, Np).
    """
    x_ref = refs[0]
    o_ref = refs[1 + 2 * num_layers]

    h = x_ref[...]  # (TM, K0p), already matmul_dtype
    for i in range(num_layers):
        w_ref = refs[1 + 2 * i]
        b_ref = refs[2 + 2 * i]
        acc = jnp.dot(h.astype(matmul_dtype), w_ref[...],
                      preferred_element_type=jnp.float32)
        acc = acc + b_ref[...]  # (1, Np) f32, broadcasts over rows
        if i < num_layers - 1:
            acc = jnp.maximum(acc, 0.0)  # ReLU in f32 (VPU)
        h = acc

    if softplus_at_end:
        # PyTorch F.softplus (beta=1, threshold=20): x if x > 20 else log1p(exp(x))
        h = jnp.where(h > 20.0, h, jnp.log1p(jnp.exp(jnp.minimum(h, 20.0))))

    o_ref[...] = h.astype(o_ref.dtype)


def _pick_tile_m(m_rows, k0p, n_pads, budget_bytes=8 * 1024 * 1024):
    """Row-tile size under a conservative VMEM budget (fits v5e/v6e/v7x)."""
    # Double-buffered pipelined buffers per row: x tile (bf16) + out tile (f32).
    per_row = 2 * (k0p * 2 + n_pads[-1] * 4)
    # Widest intermediate activation held live per row (f32, single copy).
    per_row += max([k0p] + list(n_pads)) * 4
    tm = budget_bytes // max(per_row, 1)
    tm = max(8, min(1024, (tm // 8) * 8))         # multiple of 8 sublanes
    tm = min(tm, _round_up(max(m_rows, 1), 8))    # don't exceed (padded) M
    return tm


@functools.partial(
    jax.jit,
    static_argnames=("softplus_at_end", "matmul_dtype", "tile_m", "out_dtype",
                     "orig_in_dim", "orig_out_dim"),
)
def _mlp_forward_padded(x, padded_params, *, softplus_at_end, matmul_dtype,
                        tile_m, out_dtype, orig_in_dim, orig_out_dim):
    """x: (..., orig_in_dim). padded_params: list of (Wp (Kp, Np) matmul_dtype,
    bp (1, Np) f32) with feature dims already padded to 128."""
    lead_shape = x.shape[:-1]
    x2d = x.reshape(-1, orig_in_dim)
    m_rows = x2d.shape[0]
    num_layers = len(padded_params)

    k0p = padded_params[0][0].shape[0]
    n_pads = [wp.shape[1] for (wp, _) in padded_params]
    n_last_p = n_pads[-1]

    if tile_m is None:
        tile_m = _pick_tile_m(m_rows, k0p, n_pads)
    m_pad = _round_up(max(m_rows, 1), tile_m)

    # Pad rows to the tile multiple and features to 128 lanes; cast to bf16.
    x_p = jnp.pad(x2d.astype(matmul_dtype),
                  ((0, m_pad - m_rows), (0, k0p - orig_in_dim)))

    grid = (m_pad // tile_m,)

    in_specs = [pl.BlockSpec((tile_m, k0p), lambda i: (i, 0))]
    flat_params = []
    for (wp, bp) in padded_params:
        # Same block every grid step -> weights/biases stay resident in VMEM.
        in_specs.append(pl.BlockSpec(wp.shape, lambda i: (0, 0)))
        in_specs.append(pl.BlockSpec(bp.shape, lambda i: (0, 0)))
        flat_params.extend([wp, bp])

    out_specs = pl.BlockSpec((tile_m, n_last_p), lambda i: (i, 0))

    flops = 2 * m_pad * sum(wp.shape[0] * wp.shape[1]
                            for (wp, _) in padded_params)
    transcendentals = (2 * m_pad * n_last_p) if softplus_at_end else 0
    bytes_accessed = (x_p.size * x_p.dtype.itemsize
                      + sum(wp.size * wp.dtype.itemsize
                            + bp.size * bp.dtype.itemsize
                            for (wp, bp) in padded_params)
                      + m_pad * n_last_p * jnp.dtype(out_dtype).itemsize)

    kernel = functools.partial(
        _mlp_fused_kernel,
        num_layers=num_layers,
        softplus_at_end=softplus_at_end,
        matmul_dtype=matmul_dtype,
    )

    out_p = pl.pallas_call(
        kernel,
        out_shape=jax.ShapeDtypeStruct((m_pad, n_last_p), out_dtype),
        grid=grid,
        in_specs=in_specs,
        out_specs=out_specs,
        compiler_params=pltpu.CompilerParams(
            dimension_semantics=("parallel",),
        ),
        cost_estimate=pl.CostEstimate(
            flops=flops,
            transcendentals=transcendentals,
            bytes_accessed=bytes_accessed,
        ),
    )(x_p, *flat_params)

    out = out_p[:m_rows, :orig_out_dim]
    return out.reshape(*lead_shape, orig_out_dim)


def mlp_forward(x, params, *, softplus_at_end, matmul_dtype=jnp.bfloat16,
                tile_m=None, out_dtype=jnp.float32):
    """Convenience wrapper for unpadded params.

    x: (..., input_dim).  params: list of (W^T of shape (K, N), b of shape (N,)).
    """
    padded = []
    for (w, b) in params:
        k, n = w.shape
        kp, np_ = _round_up(k, 128), _round_up(n, 128)
        wp = jnp.zeros((kp, np_), matmul_dtype).at[:k, :n].set(
            w.astype(matmul_dtype))
        bp = jnp.zeros((1, np_), jnp.float32).at[:, :n].set(
            b.astype(jnp.float32).reshape(1, n))
        padded.append((wp, bp))
    return _mlp_forward_padded(
        x, padded,
        softplus_at_end=softplus_at_end,
        matmul_dtype=matmul_dtype,
        tile_m=tile_m,
        out_dtype=out_dtype,
        orig_in_dim=params[0][0].shape[0],
        orig_out_dim=params[-1][0].shape[1],
    )


class MLP:
    """JAX/Pallas port of the PyTorch MLP (FFN) module."""

    def __init__(self, input_dim, hidden_dim, output_dim, num_layers,
                 softplus_at_end=False, *, key=None, dtype=jnp.float32,
                 matmul_dtype=jnp.bfloat16):
        self.num_layers = num_layers
        self.softplus_at_end = softplus_at_end
        self.matmul_dtype = matmul_dtype
        self.input_dim = input_dim
        self.output_dim = output_dim
        h = [hidden_dim] * (num_layers - 1)
        dims = list(zip([input_dim] + h, h + [output_dim]))

        if key is None:
            key = jax.random.PRNGKey(0)
        self.params = []
        for (n_in, n_out) in dims:
            key, wk, bk = jax.random.split(key, 3)
            # Mimics nn.Linear's uniform(-1/sqrt(fan_in), 1/sqrt(fan_in)) init.
            bound = 1.0 / jnp.sqrt(jnp.asarray(n_in, dtype))
            w = jax.random.uniform(wk, (n_in, n_out), dtype, -bound, bound)  # (K,N)=W^T
            b = jax.random.uniform(bk, (n_out,), dtype, -bound, bound)
            self.params.append((w, b))

        # Pad feature dims to 128 lanes and cast to the matmul dtype ONCE.
        self._padded_params = []
        for (w, b) in self.params:
            k, n = w.shape
            kp, np_ = _round_up(k, 128), _round_up(n, 128)
            wp = jnp.zeros((kp, np_), matmul_dtype).at[:k, :n].set(
                w.astype(matmul_dtype))
            bp = jnp.zeros((1, np_), jnp.float32).at[:, :n].set(
                b.astype(jnp.float32).reshape(1, n))
            self._padded_params.append((jax.device_put(wp), jax.device_put(bp)))

    def __call__(self, x, *, tile_m=None, out_dtype=jnp.float32):
        return _mlp_forward_padded(
            x, self._padded_params,
            softplus_at_end=self.softplus_at_end,
            matmul_dtype=self.matmul_dtype,
            tile_m=tile_m,
            out_dtype=out_dtype,
            orig_in_dim=self.input_dim,
            orig_out_dim=self.output_dim,
        )


if __name__ == "__main__":
    key = jax.random.PRNGKey(0)
    kx, kp = jax.random.split(key)

    batch, seq, input_dim = 2, 8, 32
    hidden_dim, output_dim, num_layers = 32, 16, 3

    x = jax.random.normal(kx, (batch, seq, input_dim), jnp.float32)

    mlp = MLP(input_dim, hidden_dim, output_dim, num_layers,
              softplus_at_end=True, key=kp)

    out = mlp(x)
    out = jax.block_until_ready(out)

    # Pure-JAX reference (same bf16-input / f32-accumulate math as the kernel).
    ref = x.reshape(-1, input_dim)
    for i, (w, b) in enumerate(mlp.params):
        ref = jnp.dot(ref.astype(jnp.bfloat16), w.astype(jnp.bfloat16),
                      preferred_element_type=jnp.float32) + b
        if i < num_layers - 1:
            ref = jnp.maximum(ref, 0.0)
    ref = jnp.where(ref > 20.0, ref, jnp.log1p(jnp.exp(jnp.minimum(ref, 20.0))))
    ref = ref.reshape(batch, seq, output_dim)

    assert out.shape == (batch, seq, output_dim), out.shape
    assert jnp.allclose(out, ref, atol=1e-4, rtol=1e-4), \
        float(jnp.max(jnp.abs(out - ref)))

    print("KERNEL_OK")
</pallas_src>

<mosaic_0001>
module attributes {stable_mosaic.version = 11 : i64} {
  func.func @_mlp_fused_kernel(%arg0: i32, %arg1: memref<16x128xbf16, #tpu.memory_space<vmem>>, %arg2: memref<128x128xbf16, #tpu.memory_space<vmem>>, %arg3: memref<1x128xf32, #tpu.memory_space<vmem>>, %arg4: memref<128x128xbf16, #tpu.memory_space<vmem>>, %arg5: memref<1x128xf32, #tpu.memory_space<vmem>>, %arg6: memref<128x128xbf16, #tpu.memory_space<vmem>>, %arg7: memref<1x128xf32, #tpu.memory_space<vmem>>, %arg8: memref<16x128xf32, #tpu.memory_space<vmem>>) attributes {dimension_semantics = [#tpu.dimension_semantics<parallel>], iteration_bounds = array<i64: 1>, scalar_prefetch = 0 : i64, scratch_operands = 0 : i64, tpu.core_type = #tpu.core_type<tc>, window_params = [{transform_indices = @transform_0, window_bounds = array<i64: 16, 128>}, {pipeline_mode = #tpu.pipeline_mode<synchronous>, transform_indices = @transform_1, window_bounds = array<i64: 128, 128>}, {pipeline_mode = #tpu.pipeline_mode<synchronous>, transform_indices = @transform_2, window_bounds = array<i64: 1, 128>}, {pipeline_mode = #tpu.pipeline_mode<synchronous>, transform_indices = @transform_3, window_bounds = array<i64: 128, 128>}, {pipeline_mode = #tpu.pipeline_mode<synchronous>, transform_indices = @transform_4, window_bounds = array<i64: 1, 128>}, {pipeline_mode = #tpu.pipeline_mode<synchronous>, transform_indices = @transform_5, window_bounds = array<i64: 128, 128>}, {pipeline_mode = #tpu.pipeline_mode<synchronous>, transform_indices = @transform_6, window_bounds = array<i64: 1, 128>}, {transform_indices = @transform_7, window_bounds = array<i64: 16, 128>}]} {
    %c0 = arith.constant 0 : index
    %c0_0 = arith.constant 0 : index
    %0 = vector.load %arg1[%c0, %c0_0] : memref<16x128xbf16, #tpu.memory_space<vmem>>, vector<16x128xbf16>
    %c0_1 = arith.constant 0 : index
    %c0_2 = arith.constant 0 : index
    %1 = vector.load %arg2[%c0_1, %c0_2] : memref<128x128xbf16, #tpu.memory_space<vmem>>, vector<128x128xbf16>
    %cst = arith.constant dense<0.000000e+00> : vector<16x128xf32>
    %2 = tpu.matmul %0, %1, %cst {dimension_numbers = #tpu.dot_dimension_numbers<[1], [0], [0], [1], [0, 0, 1, 1], [], []>} : vector<16x128xbf16>, vector<128x128xbf16>, vector<16x128xf32> -> vector<16x128xf32>
    %c0_3 = arith.constant 0 : index
    %c0_4 = arith.constant 0 : index
    %3 = vector.load %arg3[%c0_3, %c0_4] : memref<1x128xf32, #tpu.memory_space<vmem>>, vector<1x128xf32>
    %4 = vector.broadcast %3 : vector<1x128xf32> to vector<16x128xf32>
    %5 = arith.addf %2, %4 : vector<16x128xf32>
    %cst_5 = arith.constant 0.000000e+00 : f32
    %6 = vector.broadcast %cst_5 : f32 to vector<16x128xf32>
    %7 = arith.maximumf %5, %6 : vector<16x128xf32>
    %8 = arith.truncf %7 : vector<16x128xf32> to vector<16x128xbf16>
    %c0_6 = arith.constant 0 : index
    %c0_7 = arith.constant 0 : index
    %9 = vector.load %arg4[%c0_6, %c0_7] : memref<128x128xbf16, #tpu.memory_space<vmem>>, vector<128x128xbf16>
    %cst_8 = arith.constant dense<0.000000e+00> : vector<16x128xf32>
    %10 = tpu.matmul %8, %9, %cst_8 {dimension_numbers = #tpu.dot_dimension_numbers<[1], [0], [0], [1], [0, 0, 1, 1], [], []>} : vector<16x128xbf16>, vector<128x128xbf16>, vector<16x128xf32> -> vector<16x128xf32>
    %c0_9 = arith.constant 0 : index
    %c0_10 = arith.constant 0 : index
    %11 = vector.load %arg5[%c0_9, %c0_10] : memref<1x128xf32, #tpu.memory_space<vmem>>, vector<1x128xf32>
    %12 = vector.broadcast %11 : vector<1x128xf32> to vector<16x128xf32>
    %13 = arith.addf %10, %12 : vector<16x128xf32>
    %cst_11 = arith.constant 0.000000e+00 : f32
    %14 = vector.broadcast %cst_11 : f32 to vector<16x128xf32>
    %15 = arith.maximumf %13, %14 : vector<16x128xf32>
    %16 = arith.truncf %15 : vector<16x128xf32> to vector<16x128xbf16>
    %c0_12 = arith.constant 0 : index
    %c0_13 = arith.constant 0 : index
    %17 = vector.load %arg6[%c0_12, %c0_13] : memref<128x128xbf16, #tpu.memory_space<vmem>>, vector<128x128xbf16>
    %cst_14 = arith.constant dense<0.000000e+00> : vector<16x128xf32>
    %18 = tpu.matmul %16, %17, %cst_14 {dimension_numbers = #tpu.dot_dimension_numbers<[1], [0], [0], [1], [0, 0, 1, 1], [], []>} : vector<16x128xbf16>, vector<128x128xbf16>, vector<16x128xf32> -> vector<16x128xf32>
    %c0_15 = arith.constant 0 : index
    %c0_16 = arith.constant 0 : index
    %19 = vector.load %arg7[%c0_15, %c0_16] : memref<1x128xf32, #tpu.memory_space<vmem>>, vector<1x128xf32>
    %20 = vector.broadcast %19 : vector<1x128xf32> to vector<16x128xf32>
    %21 = arith.addf %18, %20 : vector<16x128xf32>
    %cst_17 = arith.constant 2.000000e+01 : f32
    %22 = vector.broadcast %cst_17 : f32 to vector<16x128xf32>
    %23 = arith.cmpf ogt, %21, %22 : vector<16x128xf32>
    %cst_18 = arith.constant 2.000000e+01 : f32
    %24 = vector.broadcast %cst_18 : f32 to vector<16x128xf32>
    %25 = arith.minimumf %21, %24 : vector<16x128xf32>
    %26 = math.exp %25 : vector<16x128xf32>
    %27 = math.log1p %26 : vector<16x128xf32>
    %28 = arith.select %23, %21, %27 : vector<16x128xi1>, vector<16x128xf32>
    %c0_19 = arith.constant 0 : index
    %c0_20 = arith.constant 0 : index
    %29 = vector.load %arg8[%c0_19, %c0_20] : memref<16x128xf32, #tpu.memory_space<vmem>>, vector<16x128xf32>
    tpu.vector_store %arg8[%c0_19, %c0_20], %28 {strides = array<i32>} : memref<16x128xf32, #tpu.memory_space<vmem>>, vector<16x128xf32>,
    return
  }
  func.func @transform_0(%arg0: i32) -> (i32, i32) {
    %c0_i32 = arith.constant 0 : i32
    %c0_i32_0 = arith.constant 0 : i32
    return %arg0, %c0_i32 : i32, i32
  }
  func.func @transform_1(%arg0: i32) -> (i32, i32) {
    %c0_i32 = arith.constant 0 : i32
    %c0_i32_0 = arith.constant 0 : i32
    %c0_i32_1 = arith.constant 0 : i32
    return %c0_i32, %c0_i32_0 : i32, i32
  }
  func.func @transform_2(%arg0: i32) -> (i32, i32) {
    %c0_i32 = arith.constant 0 : i32
    %c0_i32_0 = arith.constant 0 : i32
    %c0_i32_1 = arith.constant 0 : i32
    return %c0_i32, %c0_i32_0 : i32, i32
  }
  func.func @transform_3(%arg0: i32) -> (i32, i32) {
    %c0_i32 = arith.constant 0 : i32
    %c0_i32_0 = arith.constant 0 : i32
    %c0_i32_1 = arith.constant 0 : i32
    return %c0_i32, %c0_i32_0 : i32, i32
  }
  func.func @transform_4(%arg0: i32) -> (i32, i32) {
    %c0_i32 = arith.constant 0 : i32
    %c0_i32_0 = arith.constant 0 : i32
    %c0_i32_1 = arith.constant 0 : i32
    return %c0_i32, %c0_i32_0 : i32, i32
  }
  func.func @transform_5(%arg0: i32) -> (i32, i32) {
    %c0_i32 = arith.constant 0 : i32
    %c0_i32_0 = arith.constant 0 : i32
    %c0_i32_1 = arith.constant 0 : i32
    return %c0_i32, %c0_i32_0 : i32, i32
  }
  func.func @transform_6(%arg0: i32) -> (i32, i32) {
    %c0_i32 = arith.constant 0 : i32
    %c0_i32_0 = arith.constant 0 : i32
    %c0_i32_1 = arith.constant 0 : i32
    return %c0_i32, %c0_i32_0 : i32, i32
  }
  func.func @transform_7(%arg0: i32) -> (i32, i32) {
    %c0_i32 = arith.constant 0 : i32
    %c0_i32_0 = arith.constant 0 : i32
    return %arg0, %c0_i32 : i32, i32
  }
}

</mosaic_0001>

<bundles_post_ra>
// kernel: _mlp_forward_padded.1
= control target key start
LH: loop header
LB: loop body
LE: loop exit
PB: predicated region body
PF: predicated region fallthrough
CT: control target
= control target key end

     0   :  { %12 = vsyncpa [#allocation3], 0  ;;  %s826_s0 = inlined_call_operand.vmem [shape: bf16[16,128], index: 0, kind: input, shape index: {}]   ;;  %s827_s1 = inlined_call_operand.hbm [shape: bf16[128,128], index: 1, kind: input, shape index: {}]   ;;  %s828_s2 = inlined_call_operand.vmem [shape: f32[1,128], index: 2, kind: input, shape index: {}]   ;;  %s829_s3 = inlined_call_operand.hbm [shape: bf16[128,128], index: 3, kind: input, shape index: {}]   ;;  %s830_s4 = inlined_call_operand.vmem [shape: f32[1,128], index: 4, kind: input, shape index: {}]   ;;  %s831_s5 = inlined_call_operand.hbm [shape: bf16[128,128], index: 5, kind: input, shape index: {}]   ;;  %s832_s6 = inlined_call_operand.vmem [shape: f32[1,128], index: 6, kind: input, shape index: {}]   ;;  %s833_s7 = inlined_call_operand.vmem [shape: f32[16,128], index: 7, kind: output, shape index: {}]  }
   0x1   :  { %13 = vsyncpa [#allocation5], 0  ;;  %s679_s24 = smov [#allocation4]   ;;  %s680_s26 = smov [#allocation2]  }
   0x2   :  { %s35_s25 = sshll.u32 %s679_s24, 4  ;;  %s21_s27 = sshll.u32 %s680_s26, 4  ;;  %s36_s25 = int_to_ptr.vmem [resolvable:$true] %s35_s25  ;;  %s726_s27 = int_to_ptr.vmem [resolvable:$true] %s21_s27 }
   0x3   :  { %s609_s30 = scalar_lea.hbm %s829_s3, 1024 }
   0x4   :  { %p610_p0 = scmp.ne.s32.totalorder %s829_s3, %s609_s30  ;;  %p613_p1 = scmp.lt.u32.totalorder %s609_s30, %s829_s3 }
   0x6   :  { %p615_p2 = pnand %p613_p1, %p610_p0 }
   0x8   :  { %618 = shalt.err (!%p615_p2)
}
   0x9   :  { %s619_s12 = scalar_lea.vmem %s36_s25, 1024  ;;  %p624_p4 = scmp.lt.s32.totalorder %s36_s25, %s36_s25 }
   0xa   :  { %p620_p3 = scmp.ne.s32.totalorder %s36_s25, %s619_s12  ;;  %p625_p5 = scmp.lt.s32.totalorder %s619_s12, %s619_s12 }
   0xc   :  { %p626_p6 = por %p625_p5, %p624_p4 }
   0xe   :  { %p627_p7 = pnand %p626_p6, %p620_p3 }
  0x10   :  { %630 = shalt.err (!%p627_p7)
}
  0x11   :  { %s681_s13 = smov 64   ;;  %s682_s14 = smov 4  }
  0x12   :  { %41 = dma.hbm_to_vmem [thread:$0]  %s829_s3, 1024, %s36_s25, [#allocation5], %s681_s13, %s681_s13, %s682_s14  }
  0x13   :  { %s631_s19 = scalar_lea.hbm %s827_s1, 1024 }
  0x14   :  { %p632_p8 = scmp.ne.s32.totalorder %s827_s1, %s631_s19  ;;  %p635_p9 = scmp.lt.u32.totalorder %s631_s19, %s827_s1 }
  0x16   :  { %p637_p10 = pnand %p635_p9, %p632_p8 }
  0x18   :  { %640 = shalt.err (!%p637_p10)
}
  0x19   :  { %s641_s24 = scalar_lea.vmem %s726_s27, 1024  ;;  %p646_p12 = scmp.lt.s32.totalorder %s726_s27, %s726_s27 }
  0x1a   :  { %p642_p11 = scmp.ne.s32.totalorder %s726_s27, %s641_s24  ;;  %p647_p13 = scmp.lt.s32.totalorder %s641_s24, %s641_s24 }
  0x1c   :  { %p648_p0 = por %p647_p13, %p646_p12 }
  0x1e   :  { %p649_p1 = pnand %p648_p0, %p642_p11 }
  0x20   :  { %652 = shalt.err (!%p649_p1)
}
  0x21   :  { %27 = dma.hbm_to_vmem [thread:$0]  %s827_s1, 1024, %s726_s27, [#allocation3], %s681_s13, %s681_s13, %s682_s14  }
  0x22   :  { %s683_s26 = smov [#allocation6]   ;;  %s653_s8 = scalar_lea.hbm %s831_s5, 1024 }
  0x23   :  { %s49_s28 = sshll.u32 %s683_s26, 4  ;;  %p654_p2 = scmp.ne.s32.totalorder %s831_s5, %s653_s8  ;;  %s50_s28 = int_to_ptr.vmem [resolvable:$true] %s49_s28 }
  0x24   :  { %p657_p3 = scmp.lt.u32.totalorder %s653_s8, %s831_s5 }
  0x26   :  { %p659_p4 = pnand %p657_p3, %p654_p2 }
  0x28   :  { %662 = shalt.err (!%p659_p4)
}
  0x29   :  { %s663_s15 = scalar_lea.vmem %s50_s28, 1024  ;;  %p668_p6 = scmp.lt.s32.totalorder %s50_s28, %s50_s28 }
  0x2a   :  { %p664_p5 = scmp.ne.s32.totalorder %s50_s28, %s663_s15  ;;  %p669_p7 = scmp.lt.s32.totalorder %s663_s15, %s663_s15 }
  0x2c   :  { %p670_p8 = por %p669_p7, %p668_p6 }
  0x2e   :  { %p671_p9 = pnand %p670_p8, %p664_p5 }
  0x30   :  { %674 = shalt.err (!%p671_p9)
}
  0x31   :  { %55 = dma.hbm_to_vmem [thread:$0]  %s831_s5, 1024, %s50_s28, [#allocation5], %s681_s13, %s681_s13, %s682_s14  }
  0x32   :  { %675 = dma.done.wait [#allocation3], 1024  }
  0x33   :  { %676 = vsyncadd [#allocation3], 4294966272 }
  0x34   :  { %677 = dma.done.wait [#allocation5], 2048  }
  0x35   :  { %678 = vsyncadd [#allocation5], 4294965248  ;;  %v684_v0 = vmov 0.0   ;;  %vm685_vm0 = vmmov 0   ;;  %v576_v1 = vld [vmem:[#allocation2] sm:$0xff]   ;;  %v577_v2 = vld [vmem:[#allocation2 + $0x8] sm:$0xff]  }
  0x36   :  { %509 = vmatprep.subr.bf16.mxu0 %v684_v0  ;;  %525 = vmatprep.mubr.msk.bf16.mxu0 %vm685_vm0, %v684_v0  ;;  %v578_v3 = vld [vmem:[#allocation2 + $0x10] sm:$0xff]   ;;  %v585_v4 = vld [vmem:[#allocation4] sm:$0xff]   ;;  %v579_v5 = vld [vmem:[#allocation2 + $0x18] sm:$0xff]  }
  0x37   :  { %529 = vmatprep.subr.bf16.mxu1 %v684_v0  ;;  %545 = vmatprep.mubr.msk.bf16.mxu1 %vm685_vm0, %v684_v0  ;;  %v586_v6 = vld [vmem:[#allocation4 + $0x8] sm:$0xff]   ;;  %v580_v7 = vld [vmem:[#allocation2 + $0x20] sm:$0xff]   ;;  %v587_v8 = vld [vmem:[#allocation4 + $0x10] sm:$0xff]  }
  0x38   :  { %510 = vmatpush3.bf16.msra.mxu0 %v576_v1  ;;  %530 = vmatpush3.bf16.msra.mxu1 %v585_v4  ;;  %v581_v9 = vld [vmem:[#allocation2 + $0x28] sm:$0xff]   ;;  %v588_v10 = vld [vmem:[#allocation4 + $0x18] sm:$0xff]   ;;  %v582_v11 = vld [vmem:[#allocation2 + $0x30] sm:$0xff]  }
  0x39   :  { %511 = vmatprep.subr.bf16.mxu0 %v684_v0  ;;  %531 = vmatprep.subr.bf16.mxu1 %v684_v0  ;;  %v589_v12 = vld [vmem:[#allocation4 + $0x20] sm:$0xff]   ;;  %v583_v13 = vld [vmem:[#allocation2 + $0x38] sm:$0xff]   ;;  %v590_v14 = vld [vmem:[#allocation4 + $0x28] sm:$0xff]  }
  0x3a   :  { %v584_v15 = vld [vmem:[%s826_s0] sm:$0xff]   ;;  %v591_v16 = vld [vmem:[#allocation4 + $0x30] sm:$0xff]   ;;  %v592_v17 = vld [vmem:[#allocation4 + $0x38] sm:$0xff]  }
  0x3b   :  { %v593_v18 = vld [vmem:[#allocation6] sm:$0xff]   ;;  %v594_v19 = vld [vmem:[#allocation6 + $0x8] sm:$0xff]   ;;  %v595_v20 = vld [vmem:[#allocation6 + $0x10] sm:$0xff]  }
  0x3c   :  { %512 = vmatpush3.bf16.msra.mxu0 %v577_v2  ;;  %532 = vmatpush3.bf16.msra.mxu1 %v586_v6  ;;  %v596_v21 = vld [vmem:[#allocation6 + $0x18] sm:$0xff]   ;;  %v597_v22 = vld [vmem:[#allocation6 + $0x20] sm:$0xff]   ;;  %v598_v23 = vld [vmem:[#allocation6 + $0x28] sm:$0xff]  }
  0x3d   :  { %513 = vmatprep.subr.bf16.mxu0 %v684_v0  ;;  %533 = vmatprep.subr.bf16.mxu1 %v684_v0  ;;  %v454_v24 = vld [vmem:[%s828_s2] ss:$0 sm:$0xff]  ;;  %v599_v34 = vld [vmem:[#allocation6 + $0x30] sm:$0xff]   ;;  %v600_v35 = vld [vmem:[#allocation6 + $0x38] sm:$0xff]  }
  0x3e   :  { %v464_v36 = vld [vmem:[%s830_s4] ss:$0 sm:$0xff] }
  0x3f   :  { %v473_v46 = vld [vmem:[%s832_s6] ss:$0 sm:$0xff] }
  0x40   :  { %514 = vmatpush3.bf16.msra.mxu0 %v578_v3  ;;  %534 = vmatpush3.bf16.msra.mxu1 %v587_v8 }
  0x41   :  { %515 = vmatprep.subr.bf16.mxu0 %v684_v0  ;;  %535 = vmatprep.subr.bf16.mxu1 %v684_v0 }
  0x44   :  { %516 = vmatpush3.bf16.msra.mxu0 %v579_v5  ;;  %536 = vmatpush3.bf16.msra.mxu1 %v588_v10 }
  0x45   :  { %517 = vmatprep.subr.bf16.mxu0 %v684_v0  ;;  %537 = vmatprep.subr.bf16.mxu1 %v684_v0 }
  0x48   :  { %518 = vmatpush3.bf16.msra.mxu0 %v580_v7  ;;  %538 = vmatpush3.bf16.msra.mxu1 %v589_v12 }
  0x49   :  { %519 = vmatprep.subr.bf16.mxu0 %v684_v0  ;;  %539 = vmatprep.subr.bf16.mxu1 %v684_v0 }
  0x4c   :  { %520 = vmatpush3.bf16.msra.mxu0 %v581_v9  ;;  %540 = vmatpush3.bf16.msra.mxu1 %v590_v14 }
  0x4d   :  { %521 = vmatprep.subr.bf16.mxu0 %v684_v0  ;;  %541 = vmatprep.subr.bf16.mxu1 %v684_v0 }
  0x50   :  { %522 = vmatpush3.bf16.msra.mxu0 %v582_v11  ;;  %542 = vmatpush3.bf16.msra.mxu1 %v591_v16 }
  0x51   :  { %523 = vmatprep.subr.bf16.mxu0 %v684_v0  ;;  %543 = vmatprep.subr.bf16.mxu1 %v684_v0 }
  0x54   :  { %524 = vmatpush3.bf16.msra.mxu0 %v583_v13  ;;  %544 = vmatpush3.bf16.msra.mxu1 %v592_v17 }
  0x55   :  { %549 = vmatprep.subr.bf16.mxu0 %v684_v0 }
  0x57   :  { %526 = vmatmul.mubr.bf16.vlgmr.msra.gmra.mrb[0].mxu0 %v584_v15 }
  0x58   :  { %565 = vmatprep.mubr.msk.bf16.mxu0 %vm685_vm0, %v684_v0  ;;  %550 = vmatpush3.bf16.msra.mxu0 %v593_v18 }
  0x59   :  { %551 = vmatprep.subr.bf16.mxu0 %v684_v0 }
  0x5c   :  { %552 = vmatpush3.bf16.msra.mxu0 %v594_v19 }
  0x5d   :  { %553 = vmatprep.subr.bf16.mxu0 %v684_v0 }
  0x60   :  { %554 = vmatpush3.bf16.msra.mxu0 %v595_v20 }
  0x61   :  { %555 = vmatprep.subr.bf16.mxu0 %v684_v0 }
  0x64   :  { %556 = vmatpush3.bf16.msra.mxu0 %v596_v21 }
  0x65   :  { %557 = vmatprep.subr.bf16.mxu0 %v684_v0 }
  0x68   :  { %558 = vmatpush3.bf16.msra.mxu0 %v597_v22 }
  0x69   :  { %559 = vmatprep.subr.bf16.mxu0 %v684_v0 }
  0x6c   :  { %560 = vmatpush3.bf16.msra.mxu0 %v598_v23 }
  0x6d   :  { %561 = vmatprep.subr.bf16.mxu0 %v684_v0 }
  0x70   :  { %562 = vmatpush3.bf16.msra.mxu0 %v599_v34 }
  0x71   :  { %563 = vmatprep.subr.bf16.mxu0 %v684_v0 }
  0x74   :  { %564 = vmatpush3.bf16.msra.mxu0 %v600_v35 }
 0x12a   :  { %v181_v25 = vpop.f32.mrb[0].mxu0 }
 0x12b   :  { %v182_v26 = vadd.f32 %v454_v24, %v181_v25  ;;  %v527_v27 = vpop.f32.mrb[1].mxu0 }
 0x12c   :  { %v184_v28 = vpop.f32.mrb[2].mxu0 }
 0x12d   :  { %v185_v29 = vadd.f32 %v454_v24, %v184_v28  ;;  %v528_v30 = vpop.f32.mrb[3].mxu0  ;;  %v188_v31 = vmax.f32 %v182_v26, 0.0 }
 0x12f   :  { %v189_v32 = vmax.f32 %v185_v29, 0.0 }
 0x131   :  { %v190_v33 = vpack.c.bf16 %v189_v32, %v188_v31 }
 0x133   :  { %546 = vmatmul.mubr.bf16.vlgmr.msra.gmra.mrb[0].mxu1 %v190_v33 }
 0x206   :  { %v296_v37 = vpop.f32.mrb[0].mxu1 }
 0x207   :  { %v297_v38 = vadd.f32 %v464_v36, %v296_v37  ;;  %v547_v39 = vpop.f32.mrb[1].mxu1 }
 0x208   :  { %v299_v40 = vpop.f32.mrb[2].mxu1 }
 0x209   :  { %v300_v41 = vadd.f32 %v464_v36, %v299_v40  ;;  %v548_v42 = vpop.f32.mrb[3].mxu1  ;;  %v303_v43 = vmax.f32 %v297_v38, 0.0 }
 0x20b   :  { %v304_v44 = vmax.f32 %v300_v41, 0.0 }
 0x20d   :  { %v305_v45 = vpack.c.bf16 %v304_v44, %v303_v43 }
 0x20f   :  { %566 = vmatmul.mubr.bf16.vlgmr.msra.gmra.mrb[4].mxu0 %v305_v45 }
 0x2e2   :  { %v411_v47 = vpop.f32.mrb[4].mxu0 }
 0x2e3   :  { %v412_v48 = vadd.f32 %v473_v46, %v411_v47  ;;  %v567_v49 = vpop.f32.mrb[5].mxu0 }
 0x2e4   :  { %v414_v50 = vpop.f32.mrb[6].mxu0 }
 0x2e5   :  { %v420_v51 = vmin.f32 %v412_v48, 20.0  ;;  %v415_v52 = vadd.f32 %v473_v46, %v414_v50  ;;  %v568_v53 = vpop.f32.mrb[7].mxu0  ;;  %vm418_vm2 = vcmp.gt.f32.partialorder %v412_v48, 20.0 }
 0x2e7   :  { %v422_v54 = vmul.f32 1.442695, %v420_v51  ;;  %v421_v55 = vmin.f32 %v415_v52, 20.0  ;;  %vm419_vm4 = vcmp.gt.f32.partialorder %v415_v52, 20.0 }
 0x2e9   :  { %601 = vpow2.f32 %v422_v54  ;;  %v424_v56 = vmul.f32 1.442695, %v421_v55 }
 0x2eb   :  { %603 = vpow2.f32 %v424_v56 }
 0x2f3   :  { %v602_v57 = vpop.eup %601 }
 0x2f4   :  { %v426_v58 = vadd.f32 1.0, %v602_v57  ;;  %v429_v61 = vmul.f32 -0.5, %v602_v57  ;;  %v432_v0 = vand.u32 2147483647, %v602_v57 }
 0x2f5   :  { %v604_v59 = vpop.eup %603 }
 0x2f6   :  { %605 = vlog2.f32 %v426_v58  ;;  %v435_v60 = vadd.f32 1.0, %v604_v59  ;;  %v438_v62 = vmul.f32 -0.5, %v604_v59  ;;  %v430_v63 = vadd.f32 1.0, %v429_v61 }
 0x2f7   :  { %v441_v3 = vand.u32 2147483647, %v604_v59  ;;  %vm433_vm1 = vcmp.lt.f32.partialorder %v432_v0, 0.0004427343 }
 0x2f8   :  { %607 = vlog2.f32 %v435_v60  ;;  %v439_v1 = vadd.f32 1.0, %v438_v62  ;;  %v431_v5 = vmul.f32 %v602_v57, %v430_v63 }
 0x2f9   :  { %vm442_vm3 = vcmp.lt.f32.partialorder %v441_v3, 0.0004427343 }
 0x2fa   :  { %v440_v9 = vmul.f32 %v604_v59, %v439_v1 }
 0x300   :  { %v606_v2 = vpop.eup %605 }
 0x301   :  { %v428_v4 = vmul.f32 0.6931472, %v606_v2 }
 0x302   :  { %v608_v6 = vpop.eup %607 }
 0x303   :  { %v434_v7 = vsel %vm433_vm1, %v431_v5, %v428_v4  ;;  %v437_v8 = vmul.f32 0.6931472, %v608_v6 }
 0x304   :  { %v444_v10 = vsel %vm418_vm2, %v412_v48, %v434_v7 }
 0x305   :  { %446 = vst [vmem:[%s833_s7] sm:$0xff] %v444_v10  ;;  %v443_v11 = vsel %vm442_vm3, %v440_v9, %v437_v8 }
 0x306   :  { %v445_v12 = vsel %vm419_vm4, %v415_v52, %v443_v11 }
 0x307   :  { %447 = vst [vmem:[%s833_s7 + $0x8] sm:$0xff] %v445_v12 }
 0x308   :  { %452 = vsyncpa [#allocation3], 1 }
 0x309   :  { %453 = vsyncpa [#allocation5], 1 }

</bundles_post_ra>
